<compile_context>
chip_gen: v5e
topology: v5e:2x2
jax: 0.10.0
libtpu: 0.0.40
codegen_flags: <defaults>
</compile_context>

<pallas_src>
import jax
import jax.numpy as jnp
from jax.experimental import pallas as pl
from jax.experimental.pallas import tpu as pltpu


def _disc_kernel(x_ref, w1_ref, b1_ref, w2_ref, b2_ref, w3t_ref, b3_ref, o_ref):
    cdt = w1_ref.dtype                       # matmul operand dtype (f32 or bf16)
    x = x_ref[...].astype(cdt)               # (tb, D)

    h1 = jnp.tanh(                           # f32 accumulate, f32 activation
        jnp.dot(x, w1_ref[...], preferred_element_type=jnp.float32) + b1_ref[...]
    )                                        # (tb, H) f32
    h2 = jnp.tanh(
        jnp.dot(h1.astype(cdt), w2_ref[...], preferred_element_type=jnp.float32)
        + b2_ref[...]
    )                                        # (tb, H) f32

    # Compact lane-dense final layer: contract last dims of (1,H) and (tb,H)
    # -> (1, tb).  Same pattern as the flash-attention q.k^T contraction.
    logit = (
        jax.lax.dot_general(
            w3t_ref[...], h2.astype(cdt),
            dimension_numbers=(((1,), (1,)), ((), ())),
            preferred_element_type=jnp.float32,
        )
        + b3_ref[...]                        # (1,1) broadcast over lanes
    )                                        # (1, tb) f32
    o_ref[...] = jax.nn.sigmoid(logit).astype(o_ref.dtype)


def _round_up(a, m):
    return (a + m - 1) // m * m


def _num_tensorcores():
    """v7x has 2 TensorCores per chip; v5e/v6e have 1 (grid = sequential loop)."""
    try:
        kind = jax.devices()[0].device_kind.lower()
        if "v7" in kind or "7x" in kind:
            return 2
    except Exception:  # pragma: no cover - defensive
        pass
    return 1


def discriminator_forward(x, params, *, tb=2048, use_bf16=True):
    """x: [B, input_dim] (f32 or bf16).  Returns prob: [B, 1] float32."""
    w1, b1, w2, b2, w3, b3 = params
    B, D = x.shape
    H = w1.shape[1]

    # Final layer transposed once in the wrapper (tiny: H elements).
    w3t = w3.T                                   # (1, H)

    # Optional bf16 matmul operands (f32 accumulation / activations kept).
    if use_bf16:
        w1 = w1.astype(jnp.bfloat16)
        w2 = w2.astype(jnp.bfloat16)
        w3t = w3t.astype(jnp.bfloat16)

    # --- batch tile selection + ragged-batch padding -------------------------
    B8 = _round_up(B, 8)
    tb_eff = max(8, min(_round_up(tb, 8), B8))
    n_cores = _num_tensorcores()
    # Only split the grid when there are >=2 TensorCores (v7x); keep halves
    # balanced so neither core idles on a tail.
    if n_cores > 1 and B8 > 8 and pl.cdiv(B8, tb_eff) < n_cores:
        tb_eff = max(8, _round_up(pl.cdiv(B8, n_cores), 8))
    B_pad = _round_up(B, tb_eff)
    if B_pad != B:
        x = jnp.pad(x, ((0, B_pad - B), (0, 0)))
    num_tiles = B_pad // tb_eff

    weight_bytes = sum(
        int(a.size) * a.dtype.itemsize for a in (w1, b1, w2, b2, w3t, b3)
    )

    # --- explicit VMEM budget (double-buffered tiles + weights + temporaries)
    vmem_bytes = (
        2 * tb_eff * D * x.dtype.itemsize        # x tile (double-buffered)
        + 2 * tb_eff * 4                         # compact output tile
        + 2 * weight_bytes                       # resident weights (conservative)
        + 4 * tb_eff * H * 4                     # h1/h2 + cast temporaries
    )
    vmem_limit = int(min(max(2 * vmem_bytes, 16 << 20), 48 << 20))

    cost = pl.CostEstimate(
        flops=int(2 * B_pad * (D * H + H * H + H)),
        transcendentals=int(B_pad * (2 * H + 1)),
        bytes_accessed=int(B_pad * D * x.dtype.itemsize + weight_bytes + B_pad * 4),
    )

    full2 = lambda i: (0, 0)  # weights / biases: same (whole) block every step

    out = pl.pallas_call(
        _disc_kernel,
        out_shape=jax.ShapeDtypeStruct((num_tiles, 1, tb_eff), jnp.float32),
        grid_spec=pltpu.PrefetchScalarGridSpec(
            num_scalar_prefetch=0,
            grid=(num_tiles,),
            in_specs=[
                pl.BlockSpec((tb_eff, D), lambda i: (i, 0)),   # x batch tile
                pl.BlockSpec((D, H), full2),                   # W1
                pl.BlockSpec((1, H), full2),                   # b1
                pl.BlockSpec((H, H), full2),                   # W2
                pl.BlockSpec((1, H), full2),                   # b2
                pl.BlockSpec((1, H), full2),                   # W3^T
                pl.BlockSpec((1, 1), full2),                   # b3
            ],
            # Squeezed leading dim -> kernel writes a lane-dense (1, tb) row.
            out_specs=pl.BlockSpec((None, 1, tb_eff), lambda i: (i, 0, 0)),
        ),
        compiler_params=pltpu.CompilerParams(
            dimension_semantics=("parallel",),
            vmem_limit_bytes=vmem_limit,
        ),
        cost_estimate=cost,
    )(x, w1, b1, w2, b2, w3t, b3)

    prob = out.reshape(B_pad, 1)
    if B_pad != B:
        prob = prob[:B]
    return prob


def init_params(key, input_dim, hidden_dim=128):
    """Deterministic synthetic parameters (shapes mirror nn.Linear, transposed)."""
    k1, k2, k3, k4, k5, k6 = jax.random.split(key, 6)
    s1 = 1.0 / jnp.sqrt(input_dim)
    s2 = 1.0 / jnp.sqrt(hidden_dim)
    w1 = jax.random.uniform(k1, (input_dim, hidden_dim), jnp.float32, -s1, s1)
    b1 = jax.random.uniform(k2, (1, hidden_dim), jnp.float32, -s1, s1)
    w2 = jax.random.uniform(k3, (hidden_dim, hidden_dim), jnp.float32, -s2, s2)
    b2 = jax.random.uniform(k4, (1, hidden_dim), jnp.float32, -s2, s2)
    w3 = jax.random.uniform(k5, (hidden_dim, 1), jnp.float32, -s2, s2)
    b3 = jax.random.uniform(k6, (1, 1), jnp.float32, -s2, s2)
    return (w1, b1, w2, b2, w3, b3)


def reference_forward(x, params):
    w1, b1, w2, b2, w3, b3 = params
    dot = lambda a, b: jnp.dot(a, b, precision=jax.lax.Precision.HIGHEST)
    h1 = jnp.tanh(dot(x, w1) + b1)
    h2 = jnp.tanh(dot(h1, w2) + b2)
    return jax.nn.sigmoid(dot(h2, w3) + b3)


if __name__ == "__main__":
    key = jax.random.PRNGKey(0)
    kx, kp, kx2 = jax.random.split(key, 3)

    B, INPUT_DIM, HIDDEN = 8, 32, 128
    x = jax.random.normal(kx, (B, INPUT_DIM), dtype=jnp.float32)
    params = init_params(kp, INPUT_DIM, HIDDEN)
    ref = reference_forward(x, params)

    # Full-f32 path (tight tolerance).
    prob_f32 = jax.block_until_ready(
        discriminator_forward(x, params, use_bf16=False)
    )
    assert prob_f32.shape == (B, 1)
    assert jnp.allclose(prob_f32, ref, atol=2e-5, rtol=2e-5), "f32 mismatch vs reference"

    # bf16-operand path (default; f32 accumulation & activations).
    # NOTE: input precision is reduced to bf16 at the dot inputs; validated to 2e-2.
    prob_bf16 = jax.block_until_ready(
        discriminator_forward(x, params, use_bf16=True)
    )
    assert prob_bf16.shape == (B, 1)
    assert jnp.allclose(prob_bf16, ref, atol=2e-2, rtol=2e-2), "bf16 mismatch vs reference"

    # Ragged batch + multi-step grid (exercises padding and the grid loop).
    B2 = 100
    x2 = jax.random.normal(kx2, (B2, INPUT_DIM), dtype=jnp.float32)
    prob2 = jax.block_until_ready(
        discriminator_forward(x2, params, tb=64, use_bf16=False)
    )
    assert prob2.shape == (B2, 1)
    assert jnp.allclose(prob2, reference_forward(x2, params), atol=2e-5, rtol=2e-5), \
        "ragged-batch mismatch vs reference"

    print("KERNEL_OK")
</pallas_src>

<mosaic_0001>
module attributes {stable_mosaic.version = 11 : i64} {
  func.func @_disc_kernel(%arg0: i32, %arg1: memref<8x32xf32, #tpu.memory_space<vmem>>, %arg2: memref<32x128xf32, #tpu.memory_space<vmem>>, %arg3: memref<1x128xf32, #tpu.memory_space<vmem>>, %arg4: memref<128x128xf32, #tpu.memory_space<vmem>>, %arg5: memref<1x128xf32, #tpu.memory_space<vmem>>, %arg6: memref<1x128xf32, #tpu.memory_space<vmem>>, %arg7: memref<1x1xf32, #tpu.memory_space<vmem>>, %arg8: memref<1x1x8xf32, #tpu.memory_space<vmem>>) attributes {dimension_semantics = [#tpu.dimension_semantics<parallel>], iteration_bounds = array<i64: 1>, scalar_prefetch = 0 : i64, scratch_operands = 0 : i64, tpu.core_type = #tpu.core_type<tc>, window_params = [{transform_indices = @transform_0, window_bounds = array<i64: 8, 32>}, {pipeline_mode = #tpu.pipeline_mode<synchronous>, transform_indices = @transform_1, window_bounds = array<i64: 32, 128>}, {pipeline_mode = #tpu.pipeline_mode<synchronous>, transform_indices = @transform_2, window_bounds = array<i64: 1, 128>}, {pipeline_mode = #tpu.pipeline_mode<synchronous>, transform_indices = @transform_3, window_bounds = array<i64: 128, 128>}, {pipeline_mode = #tpu.pipeline_mode<synchronous>, transform_indices = @transform_4, window_bounds = array<i64: 1, 128>}, {pipeline_mode = #tpu.pipeline_mode<synchronous>, transform_indices = @transform_5, window_bounds = array<i64: 1, 128>}, {pipeline_mode = #tpu.pipeline_mode<synchronous>, transform_indices = @transform_6, window_bounds = array<i64: 1, 1>}, {transform_indices = @transform_7, window_bounds = array<i64: 1, 1, 8>}]} {
    %c0 = arith.constant 0 : index
    %c0_0 = arith.constant 0 : index
    %0 = vector.load %arg1[%c0, %c0_0] : memref<8x32xf32, #tpu.memory_space<vmem>>, vector<8x32xf32>
    %c0_1 = arith.constant 0 : index
    %c0_2 = arith.constant 0 : index
    %1 = vector.load %arg2[%c0_1, %c0_2] : memref<32x128xf32, #tpu.memory_space<vmem>>, vector<32x128xf32>
    %cst = arith.constant dense<0.000000e+00> : vector<8x128xf32>
    %2 = tpu.matmul %0, %1, %cst {dimension_numbers = #tpu.dot_dimension_numbers<[1], [0], [0], [1], [0, 0, 1, 1], [], []>} : vector<8x32xf32>, vector<32x128xf32>, vector<8x128xf32> -> vector<8x128xf32>
    %c0_3 = arith.constant 0 : index
    %c0_4 = arith.constant 0 : index
    %3 = vector.load %arg3[%c0_3, %c0_4] : memref<1x128xf32, #tpu.memory_space<vmem>>, vector<1x128xf32>
    %4 = vector.broadcast %3 : vector<1x128xf32> to vector<8x128xf32>
    %5 = arith.addf %2, %4 : vector<8x128xf32>
    %6 = math.tanh %5 : vector<8x128xf32>
    %c0_5 = arith.constant 0 : index
    %c0_6 = arith.constant 0 : index
    %7 = vector.load %arg4[%c0_5, %c0_6] : memref<128x128xf32, #tpu.memory_space<vmem>>, vector<128x128xf32>
    %cst_7 = arith.constant dense<0.000000e+00> : vector<8x128xf32>
    %8 = tpu.matmul %6, %7, %cst_7 {dimension_numbers = #tpu.dot_dimension_numbers<[1], [0], [0], [1], [0, 0, 1, 1], [], []>} : vector<8x128xf32>, vector<128x128xf32>, vector<8x128xf32> -> vector<8x128xf32>
    %c0_8 = arith.constant 0 : index
    %c0_9 = arith.constant 0 : index
    %9 = vector.load %arg5[%c0_8, %c0_9] : memref<1x128xf32, #tpu.memory_space<vmem>>, vector<1x128xf32>
    %10 = vector.broadcast %9 : vector<1x128xf32> to vector<8x128xf32>
    %11 = arith.addf %8, %10 : vector<8x128xf32>
    %12 = math.tanh %11 : vector<8x128xf32>
    %c0_10 = arith.constant 0 : index
    %c0_11 = arith.constant 0 : index
    %13 = vector.load %arg6[%c0_10, %c0_11] : memref<1x128xf32, #tpu.memory_space<vmem>>, vector<1x128xf32>
    %cst_12 = arith.constant dense<0.000000e+00> : vector<1x8xf32>
    %14 = tpu.matmul %13, %12, %cst_12 {dimension_numbers = #tpu.dot_dimension_numbers<[1], [1], [0], [0], [0, 0, 1, 0], [], []>} : vector<1x128xf32>, vector<8x128xf32>, vector<1x8xf32> -> vector<1x8xf32>
    %c0_13 = arith.constant 0 : index
    %c0_14 = arith.constant 0 : index
    %15 = vector.load %arg7[%c0_13, %c0_14] : memref<1x1xf32, #tpu.memory_space<vmem>>, vector<1x1xf32>
    %16 = vector.broadcast %15 : vector<1x1xf32> to vector<1x8xf32>
    %17 = arith.addf %14, %16 : vector<1x8xf32>
    %18 = arith.negf %17 : vector<1x8xf32>
    %19 = math.exp %18 : vector<1x8xf32>
    %cst_15 = arith.constant 1.000000e+00 : f32
    %20 = vector.broadcast %cst_15 : f32 to vector<1x8xf32>
    %21 = arith.addf %20, %19 : vector<1x8xf32>
    %22 = arith.divf %20, %21 : vector<1x8xf32>
    %c0_16 = arith.constant 0 : index
    %c0_17 = arith.constant 0 : index
    %c0_18 = arith.constant 0 : index
    %23 = vector.load %arg8[%c0_16, %c0_17, %c0_18] : memref<1x1x8xf32, #tpu.memory_space<vmem>>, vector<1x1x8xf32>
    %24 = vector.shape_cast %23 : vector<1x1x8xf32> to vector<1x8xf32>
    %25 = vector.shape_cast %22 : vector<1x8xf32> to vector<1x1x8xf32>
    tpu.vector_store %arg8[%c0_16, %c0_17, %c0_18], %25 {strides = array<i32>} : memref<1x1x8xf32, #tpu.memory_space<vmem>>, vector<1x1x8xf32>,
    return
  }
  func.func @transform_0(%arg0: i32) -> (i32, i32) {
    %c0_i32 = arith.constant 0 : i32
    %c0_i32_0 = arith.constant 0 : i32
    return %arg0, %c0_i32 : i32, i32
  }
  func.func @transform_1(%arg0: i32) -> (i32, i32) {
    %c0_i32 = arith.constant 0 : i32
    %c0_i32_0 = arith.constant 0 : i32
    %c0_i32_1 = arith.constant 0 : i32
    return %c0_i32, %c0_i32_0 : i32, i32
  }
  func.func @transform_2(%arg0: i32) -> (i32, i32) {
    %c0_i32 = arith.constant 0 : i32
    %c0_i32_0 = arith.constant 0 : i32
    %c0_i32_1 = arith.constant 0 : i32
    return %c0_i32, %c0_i32_0 : i32, i32
  }
  func.func @transform_3(%arg0: i32) -> (i32, i32) {
    %c0_i32 = arith.constant 0 : i32
    %c0_i32_0 = arith.constant 0 : i32
    %c0_i32_1 = arith.constant 0 : i32
    return %c0_i32, %c0_i32_0 : i32, i32
  }
  func.func @transform_4(%arg0: i32) -> (i32, i32) {
    %c0_i32 = arith.constant 0 : i32
    %c0_i32_0 = arith.constant 0 : i32
    %c0_i32_1 = arith.constant 0 : i32
    return %c0_i32, %c0_i32_0 : i32, i32
  }
  func.func @transform_5(%arg0: i32) -> (i32, i32) {
    %c0_i32 = arith.constant 0 : i32
    %c0_i32_0 = arith.constant 0 : i32
    %c0_i32_1 = arith.constant 0 : i32
    return %c0_i32, %c0_i32_0 : i32, i32
  }
  func.func @transform_6(%arg0: i32) -> (i32, i32) {
    %c0_i32 = arith.constant 0 : i32
    %c0_i32_0 = arith.constant 0 : i32
    %c0_i32_1 = arith.constant 0 : i32
    return %c0_i32, %c0_i32_0 : i32, i32
  }
  func.func @transform_7(%arg0: i32) -> (i32, i32, i32) {
    %c0_i32 = arith.constant 0 : i32
    %c0_i32_0 = arith.constant 0 : i32
    %c0_i32_1 = arith.constant 0 : i32
    return %arg0, %c0_i32, %c0_i32_0 : i32, i32, i32
  }
}

</mosaic_0001>

<bundles_post_ra>
// kernel: tpu_custom_call.1
= control target key start
LH: loop header
LB: loop body
LE: loop exit
PB: predicated region body
PF: predicated region fallthrough
CT: control target
= control target key end

     0   :  { %s409_s0 = inlined_call_operand.hbm [shape: f32[8,32], index: 0, kind: input, shape index: {}]   ;;  %s410_s1 = inlined_call_operand.hbm [shape: f32[32,128], index: 1, kind: input, shape index: {}]   ;;  %s411_s2 = inlined_call_operand.vmem [shape: f32[1,128], index: 2, kind: input, shape index: {}]   ;;  %s412_s3 = inlined_call_operand.hbm [shape: f32[128,128], index: 3, kind: input, shape index: {}]   ;;  %s413_s4 = inlined_call_operand.vmem [shape: f32[1,128], index: 4, kind: input, shape index: {}]   ;;  %s414_s5 = inlined_call_operand.vmem [shape: f32[1,128], index: 5, kind: input, shape index: {}]   ;;  %s415_s6 = inlined_call_operand.<no memory space> [shape: f32[1,1], index: 6, kind: input, shape index: {}]   ;;  %s416_s7 = inlined_call_operand.hbm [shape: f32[1,1,8], index: 7, kind: output, shape index: {}]  }
   0x1   :  { %v12_v0 = vstv %s415_s6 }
   0x2   :  { %13 = vst [vmem:[#allocation2] sm:$0x1] %v12_v0 }
   0x3   :  { %14 = vsyncpa [#allocation4], 0 }
   0x4   :  { %15 = vsyncpa [#allocation7], 0  ;;  %s32_s28 = sshll.u32 %s410_s1, 4  ;;  %s33_s28 = int_to_ptr.hbm [resolvable:$true] %s32_s28 }
   0x5   :  { %16 = vsyncpa [#allocation5], 0  ;;  %s338_s29 = smov [#allocation6]   ;;  %s22_s10 = sshll.u32 %s409_s0, 4  ;;  %s23_s10 = int_to_ptr.hbm [resolvable:$true] %s22_s10 }
   0x6   :  { %s34_s30 = sshll.u32 %s338_s29, 4  ;;  %s339_s11 = smov 128   ;;  %s35_s30 = int_to_ptr.vmem [resolvable:$true] %s34_s30 }
   0x7   :  { %s340_s12 = smov 8   ;;  %s341_s6 = smov [#allocation3]  }
   0x8   :  { %40 = dma.hbm_to_vmem [thread:$0]  %s33_s28, 512, %s35_s30, [#allocation7], %s339_s11, %s339_s11, %s340_s12  }
   0x9   :  { %s24_s13 = sshll.u32 %s341_s6, 4  ;;  %s47_s16 = sshll.u32 %s412_s3, 4  ;;  %s25_s13 = int_to_ptr.vmem [resolvable:$true] %s24_s13  ;;  %s48_s16 = int_to_ptr.hbm [resolvable:$true] %s47_s16 }
   0xa   :  { %27 = dma.hbm_to_vmem [thread:$0]  %s23_s10, 128, %s25_s13, [#allocation4]  }
   0xb   :  { %s342_s1 = smov [#allocation8]  }
   0xc   :  { %s49_s17 = sshll.u32 %s342_s1, 4  ;;  %s50_s17 = int_to_ptr.vmem [resolvable:$true] %s49_s17 }
   0xd   :  { %55 = dma.hbm_to_vmem [thread:$0]  %s48_s16, 2048, %s50_s17, [#allocation7], %s339_s11, %s339_s11, %s340_s12  }
   0xe   :  { %332 = dma.done.wait [#allocation4], 128  }
   0xf   :  { %333 = vsyncadd [#allocation4], 4294967168 }
  0x10   :  { %334 = dma.done.wait [#allocation7], 2560  }
  0x11   :  { %335 = vsyncadd [#allocation7], 4294964736  ;;  %v78_v1 = vld [vmem:[#allocation6 + $0x18] sm:$0xff]  ;;  %v77_v2 = vld [vmem:[#allocation6 + $0x10] sm:$0xff]  ;;  %vm83_vm0 = vcmask 261120   ;;  %v343_v27 = vmov 0  }
  0x12   :  { %99 = vmatpush.msra.mxu0 %v78_v1  ;;  %v123_v3 = vld [vmem:[#allocation8 + $0x78] sm:$0xff]  ;;  %v76_v4 = vld [vmem:[#allocation6 + $0x8] sm:$0xff]  ;;  %v122_v5 = vld [vmem:[#allocation8 + $0x70] sm:$0xff]  ;;  %225 = vset.pattern.permute.xlu0 %v343_v27  ;;  %s205_s23 = sshll.u32 %s416_s7, 4  ;;  %vm196_vm4 = vcmask 57344   ;;  %s206_s23 = int_to_ptr.hbm [resolvable:$true] %s205_s23 }
  0x13   :  { %128 = vmatpush.msra.mxu1 %v123_v3  ;;  %v121_v6 = vld [vmem:[#allocation8 + $0x68] sm:$0xff]  ;;  %v75_v7 = vld [vmem:[#allocation6] sm:$0xff]  ;;  %v74_v8 = vld [vmem:[#allocation3] sm:$0xff] }
  0x14   :  { %100 = vmatpush.msra.mxu0 %v77_v2  ;;  %v120_v9 = vld [vmem:[#allocation8 + $0x60] sm:$0xff]  ;;  %v119_v10 = vld [vmem:[#allocation8 + $0x58] sm:$0xff]  ;;  %v118_v11 = vld [vmem:[#allocation8 + $0x50] sm:$0xff] }
  0x15   :  { %129 = vmatpush.msra.mxu1 %v122_v5  ;;  %v117_v12 = vld [vmem:[#allocation8 + $0x48] sm:$0xff]  ;;  %v116_v13 = vld [vmem:[#allocation8 + $0x40] sm:$0xff]  ;;  %v115_v14 = vld [vmem:[#allocation8 + $0x38] sm:$0xff] }
  0x16   :  { %101 = vmatpush.msra.mxu0 %v76_v4  ;;  %v114_v15 = vld [vmem:[#allocation8 + $0x30] sm:$0xff]  ;;  %v113_v16 = vld [vmem:[#allocation8 + $0x28] sm:$0xff]  ;;  %v112_v17 = vld [vmem:[#allocation8 + $0x20] sm:$0xff] }
  0x17   :  { %130 = vmatpush.msra.mxu1 %v121_v6  ;;  %v111_v18 = vld [vmem:[#allocation8 + $0x18] sm:$0xff]  ;;  %v110_v19 = vld [vmem:[#allocation8 + $0x10] sm:$0xff]  ;;  %v109_v20 = vld [vmem:[#allocation8 + $0x8] sm:$0xff] }
  0x18   :  { %102 = vmatpush.msra.mxu0 %v75_v7  ;;  %v108_v21 = vld [vmem:[#allocation8] sm:$0xff]  ;;  %v226_v22 = vld [vmem:[%s411_s2] ss:$0 sm:$0xff] }
  0x19   :  { %216 = vmatmul.msk.f32.vlgmr.msra.gmra.mxu0 %vm83_vm0, %v74_v8  ;;  %131 = vmatpush.msra.mxu1 %v120_v9  ;;  %v150_v26 = vld [vmem:[#allocation2] sm:$0x1] }
  0x1a   :  { %153 = vperm.xlu0 %225, %v150_v26   ;;  %v227_v28 = vld [vmem:[%s413_s4] ss:$0 sm:$0xff]  ;;  %s344_s4 = smov [#allocation9]  }
  0x1b   :  { %132 = vmatpush.msra.mxu1 %v119_v10  ;;  %v149_v32 = vld [vmem:[%s414_s5] sm:$0x1]  ;;  %s203_s21 = sshll.u32 %s344_s4, 4  ;;  %s204_s21 = int_to_ptr.vmem [resolvable:$true] %s203_s21 }
  0x1d   :  { %133 = vmatpush.msra.mxu1 %v118_v11 }
  0x1f   :  { %134 = vmatpush.msra.mxu1 %v117_v12 }
  0x21   :  { %135 = vmatpush.msra.mxu1 %v116_v13 }
  0x23   :  { %136 = vmatpush.msra.mxu1 %v115_v14 }
  0x25   :  { %137 = vmatpush.msra.mxu1 %v114_v15 }
  0x27   :  { %138 = vmatpush.msra.mxu1 %v113_v16 }
  0x29   :  { %139 = vmatpush.msra.mxu1 %v112_v17 }
  0x2b   :  { %140 = vmatpush.msra.mxu1 %v111_v18 }
  0x2d   :  { %141 = vmatpush.msra.mxu1 %v110_v19 }
  0x2f   :  { %142 = vmatpush.msra.mxu1 %v109_v20 }
  0x31   :  { %143 = vmatpush.msra.mxu1 %v108_v21 }
  0x8c   :  { %v154_v33 = vpop.permute.xlu0 %153 }
  0x8d   :  { %v156_v34 = vperm.slane %v154_v33, 0 }
  0x96   :  { %v104_v23 = vpop.f32.mrf.mxu0 }
  0x97   :  { %v105_v24 = vadd.f32 %v226_v22, %v104_v23 }
  0x99   :  { %228 = vtanh.f32 %v105_v24 }
  0x9f   :  { %v229_v25 = vpop.eup %228 }
  0xa0   :  { %144 = vmatmul.f32.vlgmr.msra.gmra.mxu1 %v229_v25 }
 0x11d   :  { %v145_v29 = vpop.f32.mrf.mxu1 }
 0x11e   :  { %v146_v30 = vadd.f32 %v227_v28, %v145_v29 }
 0x120   :  { %230 = vtanh.f32 %v146_v30 }
 0x126   :  { %v231_v31 = vpop.eup %230 }
 0x127   :  { %172 = vmatpush.xpose.msra.mxu2 %v231_v31 }
 0x12a   :  { %173 = vmatmul.f32.vlgmr.msra.gmra.mxu2 %v149_v32 }
 0x1ad   :  { %v174_v35 = vpop.f32.mrf.mxu2 }
 0x1ae   :  { %v175_v36 = vadd.f32 %v174_v35, %v156_v34 }
 0x1b0   :  { %v217_v37 = vmul.f32 -1.442695, %v175_v36 }
 0x1b2   :  { %232 = vpow2.f32 %v217_v37 }
 0x1b8   :  { %v233_v38 = vpop.eup %232 }
 0x1b9   :  { %v180_v39 = vadd.f32 1.0, %v233_v38 }
 0x1bb   :  { %234 = vrcp.f32 %v180_v39  ;;  %v192_v43 = vand.u32 2147483648, %v180_v39  ;;  %v190_v45 = vand.u32 2147483647, %v180_v39  ;;  %vm186_vm2 = vweird.f32 %v180_v39 }
 0x1bd   :  { %v193_v47 = vor.u32 1.1754944e-38, %v192_v43  ;;  %vm191_vm5 = vcmp.eq.f32.partialorder %v190_v45, 8.507059e+37 }
 0x1c1   :  { %v235_v40 = vpop.eup %234 }
 0x1c2   :  { %v182_v41 = vmul.f32 %v235_v40, %v180_v39  ;;  %vm187_vm1 = vweird.f32 %v235_v40 }
 0x1c3   :  { %vm188_vm3 = vmor %vm186_vm2, %vm187_vm1 }
 0x1c4   :  { %v183_v42 = vsub.f32 1.0, %v182_v41 }
 0x1c6   :  { %v184_v44 = vmul.f32 %v235_v40, %v183_v42 }
 0x1c8   :  { %v185_v46 = vadd.f32 %v235_v40, %v184_v44 }
 0x1ca   :  { %v189_v48 = vsel %vm188_vm3, %v235_v40, %v185_v46 }
 0x1cb   :  { %v194_v49 = vsel %vm191_vm5, %v193_v47, %v189_v48 }
 0x1cc   :  { %197 = vst.msk [vmem:[#allocation9] sm:$0x1] %vm196_vm4, %v194_v49 }
 0x1cd   :  { %208 = dma.vmem_to_hbm [thread:$0]  %s204_s21, 16, %s206_s23, [#allocation5]  }
 0x1ce   :  { %336 = dma.done.wait [#allocation5], 16  }
 0x1cf   :  { %337 = vsyncadd [#allocation5], 4294967280 }
 0x1d0   :  { %213 = vsyncpa [#allocation4], 1 }
 0x1d1   :  { %214 = vsyncpa [#allocation7], 1 }
 0x1d2   :  { %215 = vsyncpa [#allocation5], 1 }

</bundles_post_ra>
